<compile_context>
chip_gen: v5e
topology: v5e:2x2
jax: 0.10.0
libtpu: 0.0.40
codegen_flags: <defaults>
</compile_context>

<pallas_src>
import jax
import jax.numpy as jnp
from jax.experimental import pallas as pl
from jax.experimental.pallas import tpu as pltpu


def _round_up(x, m):
    return ((x + m - 1) // m) * m


def _vmem_capacity_bytes():
    try:
        info = pltpu.get_tpu_info()
        cap = getattr(info, "vmem_capacity_bytes", None)
        if cap:
            return int(cap)
    except Exception:
        pass
    return 64 * 1024 * 1024  # conservative fallback (v7x per-TC VMEM)


def _lowrank_kernel(x_ref, wat_ref, wb_ref, b_ref, o_ref):
    # x_ref:   (bm, in_dim)     compute dtype (bf16)
    # wat_ref: (in_dim, rank)   == A.weight^T @ T.weight^T   (T folded into A)
    # wb_ref:  (rank, out_p)    == B.weight^T (optionally lane-dense padded)
    # b_ref:   (1, out_p)       == fully folded bias, f32
    h = jnp.dot(x_ref[...], wat_ref[...], preferred_element_type=jnp.float32)
    o = jnp.dot(h.astype(wb_ref.dtype), wb_ref[...],
                preferred_element_type=jnp.float32) + b_ref[...]
    o_ref[...] = o.astype(o_ref.dtype)


def low_rank_block_forward(x, params, *, bm=None, compute_dtype=jnp.bfloat16):
    """x: [batch, in_dim]. params: dict of Linear weights/biases (PyTorch layout).
    Returns [batch, out_dim] in `compute_dtype`."""
    batch, in_dim = x.shape
    rank = params["A_w"].shape[0]
    out_dim = params["B_w"].shape[0]
    hi = jax.lax.Precision.HIGHEST

    # ---- Host-side algebra (done once, in f32) --------------------------------
    #   h = x @ (A^T T^T);   y = h @ B^T + [(A_b T^T + T_b) B^T + B_b]
    wa_t = params["A_w"].T                                   # (in_dim, rank)
    wt_t = params["T_w"].T                                   # (rank, rank)
    w_at = jnp.dot(wa_t, wt_t, precision=hi)                 # (in_dim, rank)
    b_at = (jnp.dot(params["A_b"].reshape(1, rank), wt_t, precision=hi)
            + params["T_b"].reshape(1, rank))                # (1, rank)
    wb_t = params["B_w"].T                                   # (rank, out_dim)
    b_total = (jnp.dot(b_at, wb_t, precision=hi)
               + params["B_b"].reshape(1, out_dim))          # (1, out_dim), f32

    # ---- Lane-dense output only when it actually pays off ----------------------
    pad_cols = (-out_dim) % 128
    lane_dense = (pad_cols > 0) and (out_dim >= 512) and (8 * pad_cols <= out_dim)
    out_p = out_dim + pad_cols if lane_dense else out_dim
    if lane_dense:
        wb_t = jnp.pad(wb_t, ((0, 0), (0, pad_cols)))
        b_total = jnp.pad(b_total, ((0, 0), (0, pad_cols)))

    # ---- bf16 I/O (f32 accumulation in-kernel) ---------------------------------
    x_c = x.astype(compute_dtype)
    w_at = w_at.astype(compute_dtype)
    wb_t = wb_t.astype(compute_dtype)
    b_total = b_total.astype(jnp.float32)                    # bias add stays f32

    # ---- Batch tiling (no host-side padding of x) ------------------------------
    itemsize = jnp.dtype(compute_dtype).itemsize
    cap = _vmem_capacity_bytes()
    budget = int(0.6 * cap)

    def vmem_est(tile_m):
        io = 2 * 2 * tile_m * (in_dim + out_p) * itemsize    # double-buffered x/out
        w = 2 * (in_dim * rank + rank * out_p) * itemsize + 2 * out_p * 4
        return io + w

    if bm is None:
        bm = 1024
    bm = max(8, _round_up(min(bm, _round_up(batch, 8)), 8))
    # Keep >= 2 grid steps when batch allows, so v7x's 2 TCs both get work.
    if batch >= 16:
        bm = min(bm, _round_up(pl.cdiv(batch, 2), 8))
    while bm > 8 and vmem_est(bm) > budget:
        bm = _round_up(bm // 2, 8)

    grid = (pl.cdiv(batch, bm),)   # ragged last block handled by Pallas masking
    vmem_limit = int(min(int(0.75 * cap), max(32 * 1024 * 1024, 2 * vmem_est(bm))))

    # TODO(synk): on v7x, mark the constant weight/bias blocks with
    # pipeline_mode=pl.Buffered(1) (or stage them once into scratch) to avoid
    # double-buffering them and buy back VMEM headroom for a larger bm.
    out = pl.pallas_call(
        _lowrank_kernel,
        out_shape=jax.ShapeDtypeStruct((batch, out_p), compute_dtype),
        grid_spec=pl.GridSpec(
            grid=grid,
            in_specs=[
                pl.BlockSpec((bm, in_dim), lambda i: (i, 0)),
                pl.BlockSpec((in_dim, rank), lambda i: (0, 0)),
                pl.BlockSpec((rank, out_p), lambda i: (0, 0)),
                pl.BlockSpec((1, out_p), lambda i: (0, 0)),
            ],
            out_specs=pl.BlockSpec((bm, out_p), lambda i: (i, 0)),
        ),
        compiler_params=pltpu.CompilerParams(
            dimension_semantics=("parallel",),
            vmem_limit_bytes=vmem_limit,
        ),
    )(x_c, w_at, wb_t, b_total)

    return out if out_p == out_dim else out[:, :out_dim]


def init_params(key, in_dim, rank, out_dim, low_rank_init):
    """Deterministic init mirroring nn.Linear defaults (uniform +/- 1/sqrt(fan_in)).
    T.weight is copied from low_rank_init, T.bias is zeroed (as in the module)."""
    k1, k2, k3, k4 = jax.random.split(key, 4)
    bound_a = 1.0 / jnp.sqrt(in_dim)
    bound_b = 1.0 / jnp.sqrt(rank)
    return {
        "A_w": jax.random.uniform(k1, (rank, in_dim), jnp.float32, -bound_a, bound_a),
        "A_b": jax.random.uniform(k2, (rank,), jnp.float32, -bound_a, bound_a),
        "T_w": low_rank_init.astype(jnp.float32),            # (rank, rank)
        "T_b": jnp.zeros((rank,), jnp.float32),
        "B_w": jax.random.uniform(k3, (out_dim, rank), jnp.float32, -bound_b, bound_b),
        "B_b": jax.random.uniform(k4, (out_dim,), jnp.float32, -bound_b, bound_b),
    }


def reference_forward(x, p):
    hi = jax.lax.Precision.HIGHEST
    h = jnp.dot(x, p["A_w"].T, precision=hi) + p["A_b"]
    h = jnp.dot(h, p["T_w"].T, precision=hi) + p["T_b"]
    return jnp.dot(h, p["B_w"].T, precision=hi) + p["B_b"]


if __name__ == "__main__":
    in_dim, rank, out_dim = 32, 8, 24
    batch = 16

    key = jax.random.PRNGKey(0)
    kx, kinit, kp = jax.random.split(key, 3)

    x = jax.random.normal(kx, (batch, in_dim), jnp.float32)
    low_rank_init = jax.random.normal(kinit, (rank, rank), jnp.float32) * 0.1
    params = init_params(kp, in_dim, rank, out_dim, low_rank_init)

    out = low_rank_block_forward(x, params)          # bf16 I/O, f32 accumulation
    out = jax.block_until_ready(out)

    ref = reference_forward(x, params)               # f32 reference (module order)
    assert out.shape == (batch, out_dim)
    max_err = float(jnp.max(jnp.abs(out.astype(jnp.float32) - ref)))
    assert max_err < 3e-2, f"mismatch vs reference: max abs err {max_err}"

    print("KERNEL_OK")
</pallas_src>

<mosaic_0001>
module attributes {stable_mosaic.version = 11 : i64} {
  func.func @_lowrank_kernel(%arg0: i32, %arg1: memref<8x32xbf16, #tpu.memory_space<vmem>>, %arg2: memref<32x8xbf16, #tpu.memory_space<vmem>>, %arg3: memref<8x24xbf16, #tpu.memory_space<vmem>>, %arg4: memref<1x24xf32, #tpu.memory_space<vmem>>, %arg5: memref<8x24xbf16, #tpu.memory_space<vmem>>) attributes {dimension_semantics = [#tpu.dimension_semantics<parallel>], iteration_bounds = array<i64: 2>, scalar_prefetch = 0 : i64, scratch_operands = 0 : i64, tpu.core_type = #tpu.core_type<tc>, window_params = [{transform_indices = @transform_0, window_bounds = array<i64: 8, 32>}, {pipeline_mode = #tpu.pipeline_mode<synchronous>, transform_indices = @transform_1, window_bounds = array<i64: 32, 8>}, {pipeline_mode = #tpu.pipeline_mode<synchronous>, transform_indices = @transform_2, window_bounds = array<i64: 8, 24>}, {pipeline_mode = #tpu.pipeline_mode<synchronous>, transform_indices = @transform_3, window_bounds = array<i64: 1, 24>}, {transform_indices = @transform_4, window_bounds = array<i64: 8, 24>}]} {
    %c0 = arith.constant 0 : index
    %c0_0 = arith.constant 0 : index
    %0 = vector.load %arg1[%c0, %c0_0] : memref<8x32xbf16, #tpu.memory_space<vmem>>, vector<8x32xbf16>
    %c0_1 = arith.constant 0 : index
    %c0_2 = arith.constant 0 : index
    %1 = vector.load %arg2[%c0_1, %c0_2] : memref<32x8xbf16, #tpu.memory_space<vmem>>, vector<32x8xbf16>
    %cst = arith.constant dense<0.000000e+00> : vector<8x8xf32>
    %2 = tpu.matmul %0, %1, %cst {dimension_numbers = #tpu.dot_dimension_numbers<[1], [0], [0], [1], [0, 0, 1, 1], [], []>} : vector<8x32xbf16>, vector<32x8xbf16>, vector<8x8xf32> -> vector<8x8xf32>
    %3 = arith.truncf %2 : vector<8x8xf32> to vector<8x8xbf16>
    %c0_3 = arith.constant 0 : index
    %c0_4 = arith.constant 0 : index
    %4 = vector.load %arg3[%c0_3, %c0_4] : memref<8x24xbf16, #tpu.memory_space<vmem>>, vector<8x24xbf16>
    %cst_5 = arith.constant dense<0.000000e+00> : vector<8x24xf32>
    %5 = tpu.matmul %3, %4, %cst_5 {dimension_numbers = #tpu.dot_dimension_numbers<[1], [0], [0], [1], [0, 0, 1, 1], [], []>} : vector<8x8xbf16>, vector<8x24xbf16>, vector<8x24xf32> -> vector<8x24xf32>
    %c0_6 = arith.constant 0 : index
    %c0_7 = arith.constant 0 : index
    %6 = vector.load %arg4[%c0_6, %c0_7] : memref<1x24xf32, #tpu.memory_space<vmem>>, vector<1x24xf32>
    %7 = vector.broadcast %6 : vector<1x24xf32> to vector<8x24xf32>
    %8 = arith.addf %5, %7 : vector<8x24xf32>
    %9 = arith.truncf %8 : vector<8x24xf32> to vector<8x24xbf16>
    %c0_8 = arith.constant 0 : index
    %c0_9 = arith.constant 0 : index
    %10 = vector.load %arg5[%c0_8, %c0_9] : memref<8x24xbf16, #tpu.memory_space<vmem>>, vector<8x24xbf16>
    tpu.vector_store %arg5[%c0_8, %c0_9], %9 {strides = array<i32>} : memref<8x24xbf16, #tpu.memory_space<vmem>>, vector<8x24xbf16>,
    return
  }
  func.func @transform_0(%arg0: i32) -> (i32, i32) {
    %c0_i32 = arith.constant 0 : i32
    %c0_i32_0 = arith.constant 0 : i32
    return %arg0, %c0_i32 : i32, i32
  }
  func.func @transform_1(%arg0: i32) -> (i32, i32) {
    %c0_i32 = arith.constant 0 : i32
    %c0_i32_0 = arith.constant 0 : i32
    %c0_i32_1 = arith.constant 0 : i32
    return %c0_i32, %c0_i32_0 : i32, i32
  }
  func.func @transform_2(%arg0: i32) -> (i32, i32) {
    %c0_i32 = arith.constant 0 : i32
    %c0_i32_0 = arith.constant 0 : i32
    %c0_i32_1 = arith.constant 0 : i32
    return %c0_i32, %c0_i32_0 : i32, i32
  }
  func.func @transform_3(%arg0: i32) -> (i32, i32) {
    %c0_i32 = arith.constant 0 : i32
    %c0_i32_0 = arith.constant 0 : i32
    %c0_i32_1 = arith.constant 0 : i32
    return %c0_i32, %c0_i32_0 : i32, i32
  }
  func.func @transform_4(%arg0: i32) -> (i32, i32) {
    %c0_i32 = arith.constant 0 : i32
    %c0_i32_0 = arith.constant 0 : i32
    return %arg0, %c0_i32 : i32, i32
  }
}

</mosaic_0001>

<bundles_post_ra>
// kernel: tpu_custom_call.1
= control target key start
LH: loop header
LB: loop body
LE: loop exit
PB: predicated region body
PF: predicated region fallthrough
CT: control target
= control target key end

     0   :  { %9 = vsyncpa [#allocation3], 0  ;;  %s581_s0 = inlined_call_operand.vmem [shape: bf16[16,32], index: 0, kind: input, shape index: {}]   ;;  %s582_s1 = inlined_call_operand.vmem [shape: bf16[32,8], index: 1, kind: input, shape index: {}]   ;;  %s583_s2 = inlined_call_operand.vmem [shape: bf16[8,24], index: 2, kind: input, shape index: {}]   ;;  %s584_s3 = inlined_call_operand.vmem [shape: f32[1,24], index: 3, kind: input, shape index: {}]   ;;  %s585_s4 = inlined_call_operand.hbm [shape: bf16[16,24], index: 4, kind: output, shape index: {}]  }
   0x1   :  { %11 = vsyncpa [#allocation3 + $0x1], 0  ;;  %s484_s15 = smov 0   ;;  %s486_s16 = smov 0  }
   0x2   :  { %s488_s17 = smov 0   ;;  %s490_s18 = smov 0  }
   0x3 LB: > { %s505_s19 = sadd.s32 4294967295, %s457_s18   ;;  %s333_s20 = sadd.s32 4294967294, %s457_s18   ;;  %s457_s18 = sphi %s490_s18, %s591_s18   ;;  %s453_s17 = sphi %s488_s17, %s590_s17   ;;  %s449_s16 = sphi %s486_s16, %s589_s16   ;;  %s445_s15 = sphi %s484_s15, %s588_s15  }
   0x4   : > { %s509_s21 = sadd.s32 1, %s457_s18   ;;  %s113_s22 = sadd.s32 1, %s453_s17 }
   0x5   : > { %s110_s23 = ssub.s32 %s457_s18, %s509_s21  ;;  %p123_p0 = scmp.ne.s32.totalorder %s453_s17, %s449_s16 }
   0x6   : > { %p111_p1 = scmp.eq.s32.totalorder %s110_s23, 0  ;;  %p124_p2 = scmp.eq.s32.totalorder %s505_s19, 1 }
   0x7   : > { %p129_p3 = scmp.ne.s32.totalorder %s449_s16, %s445_s15  ;;  %p130_p4 = scmp.eq.s32.totalorder %s333_s20, 1 }
   0x8   : > { %s520_s24 = scalar_select %p111_p1, %s453_s17, %s113_s22  }
   0x9   : > { %p522_p5 = por %p124_p2, %p123_p0  ;;  %p526_p6 = por %p130_p4, %p129_p3 }
   0xa   : > { %p336_p7 = scmp.ge.s32.totalorder %s457_s18, 1  ;;  %p164_p8 = scmp.lt.s32.totalorder %s457_s18, 3 }
   0xc   : > { %p165_p9 = pnand %p336_p7, %p164_p8 }
   0xd   : > { %p189_p10 = scmp.lt.s32.totalorder (!%p165_p9), %s505_s19, 1  ;;  %s186_s12 = sand.u32 (!%p165_p9), 1, %s449_s16  }
   0xe   : > { %168 = sbr.rel (%p165_p9) target bundleno = 289 (0x121), region = 36  ;;  %s337_s13 = sshll.u32 (!%p165_p9), %s186_s12, 2 }
   0xf   : > { %s350_s14 = sshll.u32 (!%p165_p9), %s505_s19, 2  ;;  %s188_s29 = scalar_lea.vmem (!%p165_p9), [#allocation2], %s337_s13 }
  0x10   : > { %s269_s28 = scalar_lea.hbm (!%p165_p9), %s585_s4, %s350_s14  ;;  %s271_s30 = sshll.u32 (!%p165_p9), %s188_s29, 4  ;;  %s272_s30 = int_to_ptr.vmem [resolvable:$true] %s271_s30 }
  0x11   : > { %s415_s10 = scalar_lea.hbm (!%p165_p9), %s585_s4, 8 }
  0x13   : > { %v354_v0 = vld [vmem:[%s582_s1 + $0x8] sm:$0xff]  ;;  %v353_v1 = vld [vmem:[%s582_s1] sm:$0xff]  ;;  %s190_s5 = scalar_select %p189_p10, %s505_s19, 1  ;;  %vm211_vm0 = vcmask 261120   ;;  %vm238_vm1 = vcmask 1043456   ;;  %vm234_vm2 = vcmask 64512  }
  0x14   : > { %221 = vmatpush.bf16.msra.mxu0 %v354_v0  ;;  %v229_v3 = vld [vmem:[%s583_s2] sm:$0xf]  ;;  %vm256_vm3 = vcmask 191488   ;;  %s259_s19 = scalar_lea.sflag [#allocation3], %s186_s12 }
  0x15   : > { %s338_s6 = sshll.u32 %s190_s5, 2  ;;  %v240_v4 = vsel %vm238_vm1, %v229_v3, 0  ;;  %v394_v8 = vld [vmem:[%s584_s3] ss:$0 sm:$0xff]  ;;  %s273_s5 = sshll.u32 %s269_s28, 4  ;;  %s274_s5 = int_to_ptr.hbm [resolvable:$true] %s273_s5 }
  0x16   : > { %s192_s9 = scalar_lea.vmem %s581_s0, %s338_s6  ;;  %249 = vmatpush.bf16.msra.mxu1 %v240_v4  ;;  %s409_s6 = sshra.s32 %s274_s5, 4  ;;  %s410_s6 = int_to_ptr.hbm [resolvable:$true] %s409_s6 }
  0x17   : > { %v194_v2 = vld [vmem:[%s192_s9] sm:$0xf]  ;;  %s411_s7 = scalar_lea.hbm %s410_s6, 4  ;;  %p416_p0 = scmp.lt.s32.totalorder %s410_s6, %s585_s4 }
  0x18   : > { %222 = vmatpush.bf16.msra.mxu0 %v353_v1  ;;  %p412_p11 = scmp.ne.s32.totalorder %s410_s6, %s411_s7  ;;  %p417_p1 = scmp.lt.s32.totalorder %s415_s10, %s411_s7 }
  0x1a   : > { %p413_p12 = pnand %p412_p11, %p522_p5  ;;  %p418_p2 = por %p417_p1, %p416_p0 }
  0x1b   : > { %347 = vmatmul.msk.bf16.vlgmr.msra.gmra.mxu0 %vm211_vm0, %v194_v2 }
  0x1c   : > { %p414_p13 = pneg %p413_p12 }
  0x1e   : > { %p419_p3 = pnand %p418_p2, %p414_p13 }
  0x98   : > { %v224_v5 = vpop.f32.mrf.mxu0 }
  0x99   : > { %v228_v6 = vpack.c.bf16 %v224_v5, %v224_v5 }
  0x9b   : > { %348 = vmatmul.msk.bf16.vlgmr.msra.gmra.mxu1 %vm234_vm2, %v228_v6 }
  0xa0   : > { %v226_v7 = vpop.f32.mrf.mxu0 }
 0x118   : > { %v251_v9 = vpop.f32.mrf.mxu1 }
 0x119   : > { %v252_v10 = vadd.f32 %v394_v8, %v251_v9 }
 0x11b   : > { %v255_v11 = vpack.c.bf16 %v252_v10, %v252_v10 }
 0x11d   : > { %257 = vst.msk [vmem:[%s188_s29] sm:$0xf] %vm256_vm3, %v255_v11 }
 0x11e   : > { %422 = shalt.err (!%p419_p3)
}
 0x11f   : > { %355 = dma.vmem_to_hbm [thread:$0]  (%p522_p5), %s272_s30, 64, %s274_s5, %s259_s19  }
 0x120   : > { %v253_v12 = vpop.f32.mrf.mxu1 }
 0x121 PF: > { %p361_p4 = scmp.ge.s32.totalorder %s457_s18, 2  ;;  %s285_s12 = sand.u32 1, %s445_s15  }
 0x122   : > { %s286_s14 = scalar_lea.sflag [#allocation3], %s285_s12 }
 0x123   : > { %p358_p7 = pnand %p361_p4, %p526_p6 }
 0x125   : > { %p359_p8 = pneg %p358_p7 }
 0x127   : > { %440 = dma.done.wait (%p359_p8), %s286_s14, 64  }
 0x128   : > { %442 = vsyncadd (%p359_p8), %s286_s14, 4294967232  ;;  %p14_p9 = scmp.ge.s32.totalorder %s509_s21, 4   ;;  %s588_s15 = smov %s449_s16 }
 0x129   : > { %s589_s16 = smov %s453_s17  ;;  %s590_s17 = smov %s520_s24 }
 0x12a   : > { %s591_s18 = smov %s509_s21  ;;  %16 = sbr.rel (!%p14_p9) target bundleno = 3 (0x3), region = 71 }
 0x12f   :  { %292 = vsyncpa [#allocation3], 1 }
 0x130   :  { %294 = vsyncpa [#allocation3 + $0x1], 1 }

</bundles_post_ra>
